<compile_context>
chip_gen: v5e
topology: v5e:2x2
jax: 0.10.0
libtpu: 0.0.40
codegen_flags: <defaults>
</compile_context>

<pallas_src>
import functools
import math

import jax
import jax.numpy as jnp
from jax.experimental import pallas as pl
from jax.experimental.pallas import tpu as pltpu


# ---------------------------------------------------------------------------
# Kernel
# ---------------------------------------------------------------------------
def _adapter_mlp_kernel(x_ref, wa_ref, ba_ref, wb_ref, bb_ref, o_ref):
    # x_ref:  (tmf, f*D_in)   stored dtype (f32 or bf16); cast in-kernel
    # wa_ref: (f*D_in, f*H)   block-diagonal W_A (bf16)
    # ba_ref: (1, f*H)        f32
    # wb_ref: (f*H, f*D_out)  block-diagonal W_B (bf16)
    # bb_ref: (1, f*D_out)    f32
    # o_ref:  (tmf, f*D_out)  out dtype (bf16)
    xb = x_ref[...].astype(wa_ref.dtype)               # in-kernel cast, hidden under DMA
    h = jnp.dot(xb, wa_ref[...], preferred_element_type=jnp.float32)
    h = h + ba_ref[...]                                # bias add in f32
    h = h * jax.nn.sigmoid(h)                          # SiLU in f32 (EUP; v5e-safe)
    o = jnp.dot(h.astype(wb_ref.dtype), wb_ref[...],
                preferred_element_type=jnp.float32)
    o_ref[...] = (o + bb_ref[...]).astype(o_ref.dtype)


# ---------------------------------------------------------------------------
# Helpers
# ---------------------------------------------------------------------------
def _cdiv(a, b):
    return -(-a // b)


def _round_up(a, b):
    return _cdiv(a, b) * b


def _fold_factor(d_in, d_out):
    # Smallest f such that f*d_in and f*d_out are both multiples of 128 lanes.
    f_in = 128 // math.gcd(d_in, 128)
    f_out = 128 // math.gcd(d_out, 128)
    return math.lcm(f_in, f_out)


def _sublane_multiple(dtype):
    # f32 -> 8, bf16 -> 16, int8/fp8 -> 32.
    return 8 * (4 // jnp.dtype(dtype).itemsize)


_VMEM_WORKSET_BUDGET = 40 * 1024 * 1024   # leaves headroom on v7x (64 MiB VMEM / TC)
_HBM_BYTES_PER_STEP = 4 * 1024 * 1024     # amortize ~0.35us fixed per-step overhead
_MEGACORE_SPLIT_MIN = 2 * 1024 * 1024     # split a single tile only if each half >= this


def _plan_row_tiles(m_folded, row_align, per_row_hbm, per_row_vmem, vmem_budget):
    """Pick (folded rows per tile, number of grid steps)."""
    cap_vmem = max(row_align,
                   (vmem_budget // per_row_vmem) // row_align * row_align)
    tgt_hbm = _round_up(max(1, _HBM_BYTES_PER_STEP // per_row_hbm), row_align)
    tmf_target = max(row_align, min(cap_vmem, tgt_hbm))

    if m_folded <= tmf_target and m_folded * per_row_hbm < 2 * _MEGACORE_SPLIT_MIN:
        # One exact-fit block (block_shape == array shape): zero padding, and no
        # sublane-divisibility requirement since the block spans the full dims.
        return m_folded, 1

    m_aligned = _round_up(m_folded, row_align)
    n_steps = max(2, _cdiv(m_aligned, tmf_target))
    if n_steps % 2:                       # even grid -> balanced v7x megacore split
        n_steps += 1
    tmf = _round_up(_cdiv(m_aligned, n_steps), row_align)
    return tmf, n_steps


def fold_adapter_params(wa, ba, wb, bb, compute_dtype=jnp.bfloat16):
    """Build folded (block-diagonal) weights ONCE, outside the per-call hot path.

    wa: (D_in, H), ba: (H,), wb: (H, D_out), bb: (D_out,)  (torch weights transposed).
    """
    d_in, h = wa.shape
    d_out = wb.shape[1]
    f = _fold_factor(d_in, d_out)
    eye = jnp.eye(f, dtype=compute_dtype)
    waf = jnp.kron(eye, wa.astype(compute_dtype))                      # (f*D_in, f*H)
    wbf = jnp.kron(eye, wb.astype(compute_dtype))                      # (f*H, f*D_out)
    baf = jnp.tile(ba.astype(jnp.float32).reshape(1, h), (1, f))       # (1, f*H)
    bbf = jnp.tile(bb.astype(jnp.float32).reshape(1, d_out), (1, f))   # (1, f*D_out)
    return waf, baf, wbf, bbf, f


# ---------------------------------------------------------------------------
# Wrapper
# ---------------------------------------------------------------------------
@functools.partial(jax.jit, static_argnames=("fold", "out_dtype"))
def adapter_mlp(x, waf, baf, wbf, bbf, *, fold, out_dtype=jnp.bfloat16):
    """x: (..., D_in) in its stored dtype (f32 or bf16). Returns (..., D_out)."""
    f = fold
    d_in = waf.shape[0] // f
    hid = waf.shape[1] // f
    d_out = wbf.shape[1] // f
    lead = x.shape[:-1]

    x2d = x.reshape(-1, d_in)
    m = x2d.shape[0]
    if m == 0:
        return jnp.zeros((*lead, d_out), out_dtype)

    row_in, row_h, row_out = d_in * f, hid * f, d_out * f
    x_bytes = jnp.dtype(x.dtype).itemsize
    c_bytes = jnp.dtype(waf.dtype).itemsize
    o_bytes = jnp.dtype(out_dtype).itemsize

    # Per folded-row byte footprints (HBM stream / VMEM working set).
    per_row_hbm = row_in * x_bytes + row_out * o_bytes
    per_row_vmem = (2 * row_in * x_bytes        # x, double-buffered
                    + row_in * c_bytes          # in-kernel bf16 cast of x
                    + row_h * (4 + c_bytes)     # f32 hidden + bf16 hand-off
                    + row_out * 4               # f32 pre-cast output
                    + 2 * row_out * o_bytes)    # out, double-buffered
    weight_vmem = ((waf.size + wbf.size) * c_bytes
                   + (baf.size + bbf.size) * 4) * 2
    vmem_budget = max(4 * 1024 * 1024, _VMEM_WORKSET_BUDGET - weight_vmem)

    row_align = max(_sublane_multiple(x.dtype), _sublane_multiple(out_dtype))
    m_folded = _cdiv(m, f)
    tmf, n_steps = _plan_row_tiles(m_folded, row_align, per_row_hbm,
                                   per_row_vmem, vmem_budget)
    m_pad_f = tmf * n_steps
    m_pad = m_pad_f * f

    # Pad only when the row count requires it.  Padded rows produce garbage after
    # bias+SiLU+Linear_B, but they are sliced off below and never escape.
    if m_pad != m:
        x2d = jnp.pad(x2d, ((0, m_pad - m), (0, 0)))
    xf = x2d.reshape(m_pad_f, row_in)          # free row-major fold: f rows -> 1

    vmem_limit = int(min(64 * 1024 * 1024,
                         max(32 * 1024 * 1024,
                             (per_row_vmem * tmf + weight_vmem) * 13 // 10)))

    cost = pl.CostEstimate(
        flops=2 * m_pad_f * (row_in * row_h + row_h * row_out),
        transcendentals=m_pad_f * row_h,
        bytes_accessed=(m_pad_f * per_row_hbm
                        + (waf.size + wbf.size) * c_bytes
                        + (baf.size + bbf.size) * 4),
    )

    outf = pl.pallas_call(
        _adapter_mlp_kernel,
        out_shape=jax.ShapeDtypeStruct((m_pad_f, row_out), out_dtype),
        grid_spec=pltpu.PrefetchScalarGridSpec(
            num_scalar_prefetch=0,
            grid=(n_steps,),
            in_specs=[
                pl.BlockSpec((tmf, row_in), lambda i: (i, 0)),      # x rows (streamed)
                pl.BlockSpec((row_in, row_h), lambda i: (0, 0)),    # W_A (fetched once)
                pl.BlockSpec((1, row_h), lambda i: (0, 0)),         # b_A
                pl.BlockSpec((row_h, row_out), lambda i: (0, 0)),   # W_B
                pl.BlockSpec((1, row_out), lambda i: (0, 0)),       # b_B
            ],
            out_specs=pl.BlockSpec((tmf, row_out), lambda i: (i, 0)),
        ),
        compiler_params=pltpu.CompilerParams(
            dimension_semantics=("parallel",),
            vmem_limit_bytes=vmem_limit,
        ),
        cost_estimate=cost,
    )(xf, waf, baf, wbf, bbf)

    out2d = outf.reshape(m_pad, d_out)         # free row-major unfold
    if m_pad != m:
        out2d = out2d[:m]
    return out2d.reshape(*lead, d_out)


# ---------------------------------------------------------------------------
# Demo / self-test
# ---------------------------------------------------------------------------
def _xavier_uniform(key, fan_in, fan_out, shape, dtype=jnp.float32):
    bound = (6.0 / (fan_in + fan_out)) ** 0.5
    return jax.random.uniform(key, shape, dtype, minval=-bound, maxval=bound)


if __name__ == "__main__":
    # Small shapes consistent with the module (in=32, hidden=16, out=64).
    in_features, hidden_dim, out_features = 32, 16, 64

    key = jax.random.PRNGKey(0)
    kx1, kx2, kx3, ka, kb = jax.random.split(key, 5)

    # torch conv_A.weight: (hidden, in)  -> stored transposed as (in, hidden)
    wa = _xavier_uniform(ka, in_features, hidden_dim, (in_features, hidden_dim))
    ba = jnp.zeros((hidden_dim,), jnp.float32)
    # torch conv_B.weight: (out, hidden) -> stored transposed as (hidden, out)
    wb = _xavier_uniform(kb, hidden_dim, out_features, (hidden_dim, out_features))
    bb = jnp.zeros((out_features,), jnp.float32)

    # Folded weights built once (hoisted out of the per-call path).
    waf, baf, wbf, bbf, fold = fold_adapter_params(wa, ba, wb, bb)
    jax.block_until_ready((waf, baf, wbf, bbf))

    # Matched pure-JAX reference: bf16 inputs/weights, f32 accumulation + SiLU,
    # bf16 hand-off between the two matmuls, bf16 output (mirrors the kernel's
    # autocast-style numerics so tolerances stay tight).
    # TODO(synk): torch.cuda.amp.autocast (fp16) is emulated with bf16 here.
    def reference(x):
        f32 = jnp.float32
        xr = x.astype(jnp.bfloat16).astype(f32)
        war = wa.astype(jnp.bfloat16).astype(f32)
        wbr = wb.astype(jnp.bfloat16).astype(f32)
        hr = jax.nn.silu(xr @ war + ba)
        hr = hr.astype(jnp.bfloat16).astype(f32)
        return (hr @ wbr + bb).astype(jnp.bfloat16)

    def check(x):
        out = jax.block_until_ready(adapter_mlp(x, waf, baf, wbf, bbf, fold=fold))
        assert out.shape == x.shape[:-1] + (out_features,)
        assert out.dtype == jnp.bfloat16
        ref = reference(x)
        assert jnp.allclose(out.astype(jnp.float32), ref.astype(jnp.float32),
                            atol=2e-2, rtol=2e-2), "mismatch vs reference"

    # 1) Module-sized small input (exact single block, no padding).
    check(jax.random.normal(kx1, (2, 8, in_features), dtype=jnp.float32))
    # 2) Row count not a multiple of the fold factor (padding + [:m] slice path).
    check(jax.random.normal(kx2, (3, 5, in_features), dtype=jnp.float32))
    # 3) Larger row count: multi-step, even-length grid (v7x megacore path).
    check(jax.random.normal(kx3, (16384, in_features), dtype=jnp.float32))

    print("KERNEL_OK")
</pallas_src>

<mosaic_0001>
module attributes {stable_mosaic.version = 11 : i64} {
  func.func @_adapter_mlp_kernel(%arg0: i32, %arg1: memref<4x128xf32, #tpu.memory_space<vmem>>, %arg2: memref<128x64xbf16, #tpu.memory_space<vmem>>, %arg3: memref<1x64xf32, #tpu.memory_space<vmem>>, %arg4: memref<64x256xbf16, #tpu.memory_space<vmem>>, %arg5: memref<1x256xf32, #tpu.memory_space<vmem>>, %arg6: memref<4x256xbf16, #tpu.memory_space<vmem>>) attributes {dimension_semantics = [#tpu.dimension_semantics<parallel>], iteration_bounds = array<i64: 1>, scalar_prefetch = 0 : i64, scratch_operands = 0 : i64, tpu.core_type = #tpu.core_type<tc>, window_params = [{transform_indices = @transform_0, window_bounds = array<i64: 4, 128>}, {pipeline_mode = #tpu.pipeline_mode<synchronous>, transform_indices = @transform_1, window_bounds = array<i64: 128, 64>}, {pipeline_mode = #tpu.pipeline_mode<synchronous>, transform_indices = @transform_2, window_bounds = array<i64: 1, 64>}, {pipeline_mode = #tpu.pipeline_mode<synchronous>, transform_indices = @transform_3, window_bounds = array<i64: 64, 256>}, {pipeline_mode = #tpu.pipeline_mode<synchronous>, transform_indices = @transform_4, window_bounds = array<i64: 1, 256>}, {transform_indices = @transform_5, window_bounds = array<i64: 4, 256>}]} {
    %c0 = arith.constant 0 : index
    %c0_0 = arith.constant 0 : index
    %0 = vector.load %arg1[%c0, %c0_0] : memref<4x128xf32, #tpu.memory_space<vmem>>, vector<4x128xf32>
    %1 = arith.truncf %0 : vector<4x128xf32> to vector<4x128xbf16>
    %c0_1 = arith.constant 0 : index
    %c0_2 = arith.constant 0 : index
    %2 = vector.load %arg2[%c0_1, %c0_2] : memref<128x64xbf16, #tpu.memory_space<vmem>>, vector<128x64xbf16>
    %cst = arith.constant dense<0.000000e+00> : vector<4x64xf32>
    %3 = tpu.matmul %1, %2, %cst {dimension_numbers = #tpu.dot_dimension_numbers<[1], [0], [0], [1], [0, 0, 1, 1], [], []>} : vector<4x128xbf16>, vector<128x64xbf16>, vector<4x64xf32> -> vector<4x64xf32>
    %c0_3 = arith.constant 0 : index
    %c0_4 = arith.constant 0 : index
    %4 = vector.load %arg3[%c0_3, %c0_4] : memref<1x64xf32, #tpu.memory_space<vmem>>, vector<1x64xf32>
    %5 = vector.broadcast %4 : vector<1x64xf32> to vector<4x64xf32>
    %6 = arith.addf %3, %5 : vector<4x64xf32>
    %7 = arith.negf %6 : vector<4x64xf32>
    %8 = math.exp %7 : vector<4x64xf32>
    %cst_5 = arith.constant 1.000000e+00 : f32
    %9 = vector.broadcast %cst_5 : f32 to vector<4x64xf32>
    %10 = arith.addf %9, %8 : vector<4x64xf32>
    %11 = arith.divf %9, %10 : vector<4x64xf32>
    %12 = arith.mulf %6, %11 : vector<4x64xf32>
    %13 = arith.truncf %12 : vector<4x64xf32> to vector<4x64xbf16>
    %c0_6 = arith.constant 0 : index
    %c0_7 = arith.constant 0 : index
    %14 = vector.load %arg4[%c0_6, %c0_7] : memref<64x256xbf16, #tpu.memory_space<vmem>>, vector<64x256xbf16>
    %cst_8 = arith.constant dense<0.000000e+00> : vector<4x256xf32>
    %15 = tpu.matmul %13, %14, %cst_8 {dimension_numbers = #tpu.dot_dimension_numbers<[1], [0], [0], [1], [0, 0, 1, 1], [], []>} : vector<4x64xbf16>, vector<64x256xbf16>, vector<4x256xf32> -> vector<4x256xf32>
    %c0_9 = arith.constant 0 : index
    %c0_10 = arith.constant 0 : index
    %16 = vector.load %arg5[%c0_9, %c0_10] : memref<1x256xf32, #tpu.memory_space<vmem>>, vector<1x256xf32>
    %17 = vector.broadcast %16 : vector<1x256xf32> to vector<4x256xf32>
    %18 = arith.addf %15, %17 : vector<4x256xf32>
    %19 = arith.truncf %18 : vector<4x256xf32> to vector<4x256xbf16>
    %c0_11 = arith.constant 0 : index
    %c0_12 = arith.constant 0 : index
    %20 = vector.load %arg6[%c0_11, %c0_12] : memref<4x256xbf16, #tpu.memory_space<vmem>>, vector<4x256xbf16>
    tpu.vector_store %arg6[%c0_11, %c0_12], %19 {strides = array<i32>} : memref<4x256xbf16, #tpu.memory_space<vmem>>, vector<4x256xbf16>,
    return
  }
  func.func @transform_0(%arg0: i32) -> (i32, i32) {
    %c0_i32 = arith.constant 0 : i32
    %c0_i32_0 = arith.constant 0 : i32
    return %arg0, %c0_i32 : i32, i32
  }
  func.func @transform_1(%arg0: i32) -> (i32, i32) {
    %c0_i32 = arith.constant 0 : i32
    %c0_i32_0 = arith.constant 0 : i32
    %c0_i32_1 = arith.constant 0 : i32
    return %c0_i32, %c0_i32_0 : i32, i32
  }
  func.func @transform_2(%arg0: i32) -> (i32, i32) {
    %c0_i32 = arith.constant 0 : i32
    %c0_i32_0 = arith.constant 0 : i32
    %c0_i32_1 = arith.constant 0 : i32
    return %c0_i32, %c0_i32_0 : i32, i32
  }
  func.func @transform_3(%arg0: i32) -> (i32, i32) {
    %c0_i32 = arith.constant 0 : i32
    %c0_i32_0 = arith.constant 0 : i32
    %c0_i32_1 = arith.constant 0 : i32
    return %c0_i32, %c0_i32_0 : i32, i32
  }
  func.func @transform_4(%arg0: i32) -> (i32, i32) {
    %c0_i32 = arith.constant 0 : i32
    %c0_i32_0 = arith.constant 0 : i32
    %c0_i32_1 = arith.constant 0 : i32
    return %c0_i32, %c0_i32_0 : i32, i32
  }
  func.func @transform_5(%arg0: i32) -> (i32, i32) {
    %c0_i32 = arith.constant 0 : i32
    %c0_i32_0 = arith.constant 0 : i32
    return %arg0, %c0_i32 : i32, i32
  }
}

</mosaic_0001>

<bundles_post_ra>
// kernel: adapter_mlp.1
= control target key start
LH: loop header
LB: loop body
LE: loop exit
PB: predicated region body
PF: predicated region fallthrough
CT: control target
= control target key end

     0   :  { %vm179_vm4 = vcmask 523264   ;;  %vm212_vm5 = vcmask 1041408   ;;  %s424_s1 = inlined_call_operand.vmem [shape: bf16[128,64], index: 1, kind: input, shape index: {}]   ;;  %s425_s2 = inlined_call_operand.vmem [shape: f32[1,64], index: 2, kind: input, shape index: {}]   ;;  %s426_s0 = inlined_call_operand.vmem [shape: f32[4,128], index: 0, kind: input, shape index: {}]   ;;  %s427_s3 = inlined_call_operand.vmem [shape: bf16[64,256], index: 3, kind: input, shape index: {}]   ;;  %s428_s4 = inlined_call_operand.vmem [shape: f32[1,256], index: 4, kind: input, shape index: {}]   ;;  %s429_s5 = inlined_call_operand.vmem [shape: bf16[4,256], index: 5, kind: output, shape index: {}]  }
   0x1   :  { %v296_v0 = vld [vmem:[%s424_s1 + $0x38] sm:$0xff]  ;;  %v295_v1 = vld [vmem:[%s424_s1 + $0x30] sm:$0xff]  ;;  %v294_v2 = vld [vmem:[%s424_s1 + $0x28] sm:$0xff] }
   0x2   :  { %91 = vmatpush.bf16.msra.mxu0 %v296_v0  ;;  %v293_v3 = vld [vmem:[%s424_s1 + $0x20] sm:$0xff]  ;;  %v292_v4 = vld [vmem:[%s424_s1 + $0x18] sm:$0xff]  ;;  %v291_v5 = vld [vmem:[%s424_s1 + $0x10] sm:$0xff] }
   0x3   :  { %v290_v6 = vld [vmem:[%s424_s1 + $0x8] sm:$0xff]  ;;  %v289_v7 = vld [vmem:[%s424_s1] sm:$0xff]  ;;  %v281_v10 = vld [vmem:[%s427_s3 + $0x30] sm:$0xf] }
   0x4   :  { %v21_v8 = vld [vmem:[%s426_s0] sm:$0xf]  ;;  %v304_v11 = vld [vmem:[%s427_s3 + $0x34] sm:$0xf0]  ;;  %v303_v12 = vld [vmem:[%s427_s3 + $0x34] sm:$0xf] }
   0x5   :  { %v22_v9 = vpack.c.bf16 %v21_v8, %v21_v8  ;;  %v282_v13 = vor.u32 %v304_v11, %v281_v10  ;;  %v283_v14 = vld [vmem:[%s427_s3 + $0x38] sm:$0xf0]  ;;  %v273_v16 = vld [vmem:[%s427_s3 + $0x20] sm:$0xf]  ;;  %v302_v17 = vld [vmem:[%s427_s3 + $0x24] sm:$0xf0] }
   0x6   :  { %92 = vmatpush.bf16.msra.mxu0 %v295_v1  ;;  %v286_v15 = vor.u32 %v303_v12, %v283_v14  ;;  %v301_v18 = vld [vmem:[%s427_s3 + $0x24] sm:$0xf]  ;;  %v274_v19 = vor.u32 %v302_v17, %v273_v16  ;;  %v275_v20 = vld [vmem:[%s427_s3 + $0x28] sm:$0xf0]  ;;  %v265_v22 = vld [vmem:[%s427_s3 + $0x10] sm:$0xf] }
   0x7   :  { %187 = vmatpush.bf16.msra.mxu1 %v282_v13  ;;  %v278_v21 = vor.u32 %v301_v18, %v275_v20  ;;  %v300_v23 = vld [vmem:[%s427_s3 + $0x14] sm:$0xf0]  ;;  %v299_v24 = vld [vmem:[%s427_s3 + $0x14] sm:$0xf]  ;;  %v267_v26 = vld [vmem:[%s427_s3 + $0x18] sm:$0xf0] }
   0x8   :  { %200 = vmatpush.bf16.msra.mxu2 %v286_v15  ;;  %v266_v25 = vor.u32 %v300_v23, %v265_v22  ;;  %v270_v27 = vor.u32 %v299_v24, %v267_v26  ;;  %v305_v28 = vld [vmem:[%s425_s2] ss:$0 sm:$0xff]  ;;  %v298_v30 = vld [vmem:[%s427_s3 + $0x4] sm:$0xf0]  ;;  %v297_v31 = vld [vmem:[%s427_s3 + $0x4] sm:$0xf] }
   0x9   :  { %v257_v29 = vld [vmem:[%s427_s3] sm:$0xf]  ;;  %v259_v33 = vld [vmem:[%s427_s3 + $0x8] sm:$0xf0] }
   0xa   :  { %93 = vmatpush.bf16.msra.mxu0 %v294_v2  ;;  %v258_v32 = vor.u32 %v298_v30, %v257_v29  ;;  %v262_v34 = vor.u32 %v297_v31, %v259_v33  ;;  %v133_v53 = vld [vmem:[%s428_s4] sm:$0x3] }
   0xb   :  { %188 = vmatpush.bf16.msra.mxu1 %v274_v19  ;;  %v135_v55 = vperm.slane %v133_v53, 0  ;;  %v136_v56 = vperm.slane %v133_v53, 1 }
   0xc   :  { %201 = vmatpush.bf16.msra.mxu2 %v278_v21 }
   0xe   :  { %94 = vmatpush.bf16.msra.mxu0 %v293_v3 }
   0xf   :  { %189 = vmatpush.bf16.msra.mxu1 %v266_v25 }
  0x10   :  { %202 = vmatpush.bf16.msra.mxu2 %v270_v27 }
  0x12   :  { %95 = vmatpush.bf16.msra.mxu0 %v292_v4 }
  0x13   :  { %190 = vmatpush.bf16.msra.mxu1 %v258_v32 }
  0x14   :  { %203 = vmatpush.bf16.msra.mxu2 %v262_v34 }
  0x16   :  { %96 = vmatpush.bf16.msra.mxu0 %v291_v5 }
  0x1a   :  { %97 = vmatpush.bf16.msra.mxu0 %v290_v6 }
  0x1e   :  { %98 = vmatpush.bf16.msra.mxu0 %v289_v7 }
  0x21   :  { %99 = vmatmul.bf16.vlgmr.msra.gmra.mxu0 %v22_v9 }
  0x9e   :  { %v100_v35 = vpop.f32.mrf.mxu0 }
  0x9f   :  { %v101_v36 = vadd.f32 %v305_v28, %v100_v35 }
  0xa1   :  { %v254_v37 = vmul.f32 -1.442695, %v101_v36 }
  0xa3   :  { %306 = vpow2.f32 %v254_v37 }
  0xa6   :  { %v102_v38 = vpop.f32.mrf.mxu0 }
  0xa9   :  { %v307_v39 = vpop.eup %306 }
  0xaa   :  { %v107_v40 = vadd.f32 1.0, %v307_v39 }
  0xac   :  { %308 = vrcp.f32 %v107_v40  ;;  %v119_v44 = vand.u32 2147483648, %v107_v40  ;;  %v117_v46 = vand.u32 2147483647, %v107_v40  ;;  %vm113_vm1 = vweird.f32 %v107_v40 }
  0xae   :  { %v120_v48 = vor.u32 1.1754944e-38, %v119_v44  ;;  %vm118_vm3 = vcmp.eq.f32.partialorder %v117_v46, 8.507059e+37 }
  0xb2   :  { %v309_v41 = vpop.eup %308 }
  0xb3   :  { %v109_v42 = vmul.f32 %v309_v41, %v107_v40  ;;  %vm114_vm0 = vweird.f32 %v309_v41 }
  0xb4   :  { %vm115_vm2 = vmor %vm113_vm1, %vm114_vm0 }
  0xb5   :  { %v110_v43 = vsub.f32 1.0, %v109_v42 }
  0xb7   :  { %v111_v45 = vmul.f32 %v309_v41, %v110_v43 }
  0xb9   :  { %v112_v47 = vadd.f32 %v309_v41, %v111_v45 }
  0xbb   :  { %v116_v49 = vsel %vm115_vm2, %v309_v41, %v112_v47 }
  0xbc   :  { %v121_v50 = vsel %vm118_vm3, %v120_v48, %v116_v49 }
  0xbd   :  { %v123_v51 = vmul.f32 %v121_v50, %v101_v36 }
  0xbf   :  { %v124_v52 = vpack.c.bf16 %v123_v51, %v123_v51 }
  0xc1   :  { %287 = vmatmul.msk.bf16.vlgmr.msra.gmra.mxu1 %vm179_vm4, %v124_v52  ;;  %288 = vmatmul.msk.bf16.vlgmr.msra.gmra.mxu2 %vm179_vm4, %v124_v52 }
 0x13e   :  { %v192_v54 = vpop.f32.mrf.mxu1 }
 0x13f   :  { %v193_v58 = vadd.f32 %v192_v54, %v135_v55 }
 0x144   :  { %v205_v57 = vpop.f32.mrf.mxu2 }
 0x145   :  { %v206_v59 = vadd.f32 %v205_v57, %v136_v56 }
 0x146   :  { %v194_v60 = vpop.f32.mrf.mxu1 }
 0x147   :  { %v209_v61 = vpack.c.bf16 %v206_v59, %v193_v58 }
 0x149   :  { %v211_v62 = vrot.slane %v209_v61, 2 }
 0x14b   :  { %v215_v63 = vsel %vm212_vm5, %v209_v61, %v211_v62 }
 0x14c   :  { %217 = vst [vmem:[%s429_s5] sm:$0xf] %v215_v63  ;;  %v207_v0 = vpop.f32.mrf.mxu2 }

</bundles_post_ra>
